<compile_context>
chip_gen: v6e
topology: v6e:2x2x1
jax: 0.10.0
libtpu: 0.0.40
codegen_flags: <defaults>
</compile_context>

<pallas_src>
import jax
import jax.numpy as jnp
from jax.experimental import pallas as pl
from jax.experimental.pallas import tpu as pltpu


def _round_up(x: int, m: int) -> int:
    return ((x + m - 1) // m) * m


def _classifier_kernel(x_ref, w_ref, b_ref, o_ref, acc_ref):
    # x_ref:   (TB, TK)    bf16   batch/K tile of flattened input
    # w_ref:   (TK, Cp)    bf16   K tile of weights (lane-padded classes)
    # b_ref:   (1,  Cp)    f32    bias (pad columns = -1e30)
    # o_ref:   (TB, Cp)    f32    probabilities (lane-dense store)
    # acc_ref: (TB, Cp)    f32    VMEM accumulator, persists across the K axis
    k = pl.program_id(1)

    @pl.when(k == 0)
    def _():
        acc_ref[...] = jnp.zeros_like(acc_ref)

    acc_ref[...] += jnp.dot(
        x_ref[...], w_ref[...], preferred_element_type=jnp.float32
    )

    @pl.when(k == pl.num_programs(1) - 1)
    def _():
        logits = acc_ref[...] + b_ref[...]          # f32; pad cols ~ -1e30
        m = jnp.max(logits, axis=-1, keepdims=True)
        e = jnp.exp(logits - m)                     # pad cols -> exactly 0
        denom = jnp.sum(e, axis=-1, keepdims=True)
        o_ref[...] = e * pl.reciprocal(denom, approx=True)


def classifier_forward(x_nchw, w, b, *, tb_max=512, tk_max=512):
    """x_nchw: (B, C, H, W) float; w: (D, n_classes); b: (n_classes,)."""
    B = x_nchw.shape[0]
    D, n_classes = w.shape
    if n_classes < 2:
        raise ValueError("Number of classes must be at least 2.")

    # ---- tile / padding geometry -------------------------------------------
    # Lane-dense class axis (multiple of 128).
    C_pad = _round_up(n_classes, 128)
    # Sublane-aligned batch tile; pad batch up to a whole number of tiles.
    TB = _round_up(min(tb_max, _round_up(B, 8)), 8)
    B_pad = _round_up(B, TB)
    # Lane-aligned K tile; pad D up to a whole number of K tiles.
    TK = _round_up(min(tk_max, _round_up(D, 128)), 128)
    D_pad = _round_up(D, TK)

    # ---- operand preparation (XLA glue: pad + cast) ------------------------
    x_flat = x_nchw.reshape(B, D)
    x_p = (
        jnp.zeros((B_pad, D_pad), jnp.bfloat16)
        .at[:B, :D].set(x_flat.astype(jnp.bfloat16))
    )
    w_p = (
        jnp.zeros((D_pad, C_pad), jnp.bfloat16)
        .at[:D, :n_classes].set(w.astype(jnp.bfloat16))
    )
    # Pad-class bias = -1e30 so those columns vanish under exp().
    b_p = (
        jnp.full((1, C_pad), -1e30, jnp.float32)
        .at[0, :n_classes].set(b.astype(jnp.float32))
    )

    grid = (B_pad // TB, D_pad // TK)

    out = pl.pallas_call(
        _classifier_kernel,
        out_shape=jax.ShapeDtypeStruct((B_pad, C_pad), jnp.float32),
        grid_spec=pltpu.PrefetchScalarGridSpec(
            num_scalar_prefetch=0,
            grid=grid,
            in_specs=[
                pl.BlockSpec((TB, TK), lambda i, k: (i, k)),      # x tile
                pl.BlockSpec((TK, C_pad), lambda i, k: (k, 0)),   # W K-tile
                pl.BlockSpec((1, C_pad), lambda i, k: (0, 0)),    # bias (resident)
            ],
            out_specs=pl.BlockSpec((TB, C_pad), lambda i, k: (i, 0)),
            scratch_shapes=[pltpu.VMEM((TB, C_pad), jnp.float32)],
        ),
        compiler_params=pltpu.CompilerParams(
            dimension_semantics=("parallel", "arbitrary"),
        ),
    )(x_p, w_p, b_p)

    # Drop batch / class padding outside the kernel.
    return out[:B, :n_classes]


if __name__ == "__main__":
    # Small shapes consistent with an image-classifier forward pass.
    B, C, H, W_ = 2, 4, 16, 16
    n_classes = 10
    D = C * H * W_

    key = jax.random.PRNGKey(0)
    kx, kw, kb = jax.random.split(key, 3)

    x = jax.random.normal(kx, (B, C, H, W_), dtype=jnp.float32)
    # Deterministic parameter init (synthetic, not a checkpoint load).
    w = jax.random.normal(kw, (D, n_classes), dtype=jnp.float32) * (1.0 / D) ** 0.5
    b = jax.random.normal(kb, (n_classes,), dtype=jnp.float32) * 0.01

    probs = classifier_forward(x, w, b)
    probs = jax.block_until_ready(probs)

    # Sanity: correct shape and rows sum to 1 (valid probabilities).
    # Tolerance reflects approx reciprocal (~1e-3) in the softmax normalizer.
    assert probs.shape == (B, n_classes)
    row_sums = jnp.sum(probs, axis=-1)
    assert bool(jnp.allclose(row_sums, jnp.ones((B,), jnp.float32), atol=5e-3))

    # Cross-check against a pure-JAX reference using the same bf16 MXU operands.
    x_bf = x.reshape(B, D).astype(jnp.bfloat16).astype(jnp.float32)
    w_bf = w.astype(jnp.bfloat16).astype(jnp.float32)
    logits_ref = x_bf @ w_bf + b
    ref = jax.nn.softmax(logits_ref, axis=-1)
    assert bool(jnp.allclose(probs, ref, atol=5e-3))

    print("KERNEL_OK")
</pallas_src>

<mosaic_0001>
module attributes {stable_mosaic.version = 11 : i64} {
  func.func @_classifier_kernel(%arg0: i32, %arg1: i32, %arg2: memref<8x512xbf16, #tpu.memory_space<vmem>>, %arg3: memref<512x128xbf16, #tpu.memory_space<vmem>>, %arg4: memref<1x128xf32, #tpu.memory_space<vmem>>, %arg5: memref<8x128xf32, #tpu.memory_space<vmem>>, %arg6: memref<8x128xf32, #tpu.memory_space<vmem>>) attributes {dimension_semantics = [#tpu.dimension_semantics<parallel>, #tpu.dimension_semantics<arbitrary>], iteration_bounds = array<i64: 1, 2>, scalar_prefetch = 0 : i64, scratch_operands = 1 : i64, tpu.core_type = #tpu.core_type<tc>, window_params = [{transform_indices = @transform_0, window_bounds = array<i64: 8, 512>}, {transform_indices = @transform_1, window_bounds = array<i64: 512, 128>}, {pipeline_mode = #tpu.pipeline_mode<synchronous>, transform_indices = @transform_2, window_bounds = array<i64: 1, 128>}, {transform_indices = @transform_3, window_bounds = array<i64: 8, 128>}]} {
    %c0_i32 = arith.constant 0 : i32
    %0 = arith.cmpi eq, %arg1, %c0_i32 : i32
    %1 = arith.extui %0 : i1 to i32
    %c0_i32_0 = arith.constant 0 : i32
    %2 = arith.cmpi ne, %1, %c0_i32_0 : i32
    scf.if %2 {
      %cst_9 = arith.constant 0.000000e+00 : f32
      %12 = vector.broadcast %cst_9 : f32 to vector<8x128xf32>
      %c0_10 = arith.constant 0 : index
      %c0_11 = arith.constant 0 : index
      %13 = vector.load %arg6[%c0_10, %c0_11] : memref<8x128xf32, #tpu.memory_space<vmem>>, vector<8x128xf32>
      tpu.vector_store %arg6[%c0_10, %c0_11], %12 {strides = array<i32>} : memref<8x128xf32, #tpu.memory_space<vmem>>, vector<8x128xf32>,
    } else {
    }
    %c0 = arith.constant 0 : index
    %c0_1 = arith.constant 0 : index
    %3 = vector.load %arg6[%c0, %c0_1] : memref<8x128xf32, #tpu.memory_space<vmem>>, vector<8x128xf32>
    %c0_2 = arith.constant 0 : index
    %c0_3 = arith.constant 0 : index
    %4 = vector.load %arg2[%c0_2, %c0_3] : memref<8x512xbf16, #tpu.memory_space<vmem>>, vector<8x512xbf16>
    %c0_4 = arith.constant 0 : index
    %c0_5 = arith.constant 0 : index
    %5 = vector.load %arg3[%c0_4, %c0_5] : memref<512x128xbf16, #tpu.memory_space<vmem>>, vector<512x128xbf16>
    %cst = arith.constant dense<0.000000e+00> : vector<8x128xf32>
    %6 = tpu.matmul %4, %5, %cst {dimension_numbers = #tpu.dot_dimension_numbers<[1], [0], [0], [1], [0, 0, 1, 1], [], []>} : vector<8x512xbf16>, vector<512x128xbf16>, vector<8x128xf32> -> vector<8x128xf32>
    %7 = arith.addf %3, %6 : vector<8x128xf32>
    %c0_6 = arith.constant 0 : index
    %c0_7 = arith.constant 0 : index
    %8 = vector.load %arg6[%c0_6, %c0_7] : memref<8x128xf32, #tpu.memory_space<vmem>>, vector<8x128xf32>
    tpu.vector_store %arg6[%c0_6, %c0_7], %7 {strides = array<i32>} : memref<8x128xf32, #tpu.memory_space<vmem>>, vector<8x128xf32>,
    %c1_i32 = arith.constant 1 : i32
    %9 = arith.cmpi eq, %arg1, %c1_i32 : i32
    %10 = arith.extui %9 : i1 to i32
    %c0_i32_8 = arith.constant 0 : i32
    %11 = arith.cmpi ne, %10, %c0_i32_8 : i32
    scf.if %11 {
      %c0_9 = arith.constant 0 : index
      %c0_10 = arith.constant 0 : index
      %12 = vector.load %arg6[%c0_9, %c0_10] : memref<8x128xf32, #tpu.memory_space<vmem>>, vector<8x128xf32>
      %c0_11 = arith.constant 0 : index
      %c0_12 = arith.constant 0 : index
      %13 = vector.load %arg4[%c0_11, %c0_12] : memref<1x128xf32, #tpu.memory_space<vmem>>, vector<1x128xf32>
      %14 = vector.broadcast %13 : vector<1x128xf32> to vector<8x128xf32>
      %15 = arith.addf %12, %14 : vector<8x128xf32>
      %cst_13 = arith.constant dense<0xFF800000> : vector<8xf32>
      %16 = vector.multi_reduction <maximumf>, %15, %cst_13 [1] : vector<8x128xf32> to vector<8xf32>
      %17 = vector.shape_cast %16 : vector<8xf32> to vector<8x1xf32>
      %18 = vector.broadcast %17 : vector<8x1xf32> to vector<8x128xf32>
      %19 = arith.subf %15, %18 : vector<8x128xf32>
      %20 = math.exp %19 : vector<8x128xf32>
      %cst_14 = arith.constant dense<0.000000e+00> : vector<8xf32>
      %21 = vector.multi_reduction <add>, %20, %cst_14 [1] : vector<8x128xf32> to vector<8xf32>
      %22 = vector.shape_cast %21 : vector<8xf32> to vector<8x1xf32>
      %23 = tpu.reciprocal %22 {approx = true} : vector<8x1xf32> -> vector<8x1xf32>
      %24 = vector.broadcast %23 : vector<8x1xf32> to vector<8x128xf32>
      %25 = arith.mulf %20, %24 : vector<8x128xf32>
      %c0_15 = arith.constant 0 : index
      %c0_16 = arith.constant 0 : index
      %26 = vector.load %arg5[%c0_15, %c0_16] : memref<8x128xf32, #tpu.memory_space<vmem>>, vector<8x128xf32>
      tpu.vector_store %arg5[%c0_15, %c0_16], %25 {strides = array<i32>} : memref<8x128xf32, #tpu.memory_space<vmem>>, vector<8x128xf32>,
    } else {
    }
    return
  }
  func.func @transform_0(%arg0: i32, %arg1: i32) -> (i32, i32) {
    %c0_i32 = arith.constant 0 : i32
    return %arg0, %arg1 : i32, i32
  }
  func.func @transform_1(%arg0: i32, %arg1: i32) -> (i32, i32) {
    %c0_i32 = arith.constant 0 : i32
    %c0_i32_0 = arith.constant 0 : i32
    return %arg1, %c0_i32 : i32, i32
  }
  func.func @transform_2(%arg0: i32, %arg1: i32) -> (i32, i32) {
    %c0_i32 = arith.constant 0 : i32
    %c0_i32_0 = arith.constant 0 : i32
    %c0_i32_1 = arith.constant 0 : i32
    return %c0_i32, %c0_i32_0 : i32, i32
  }
  func.func @transform_3(%arg0: i32, %arg1: i32) -> (i32, i32) {
    %c0_i32 = arith.constant 0 : i32
    %c0_i32_0 = arith.constant 0 : i32
    return %arg0, %c0_i32 : i32, i32
  }
}

</mosaic_0001>

<bundles_post_ra>
// kernel: tpu_custom_call.1
= control target key start
LH: loop header
LB: loop body
LE: loop exit
PB: predicated region body
PF: predicated region fallthrough
CT: control target
= control target key end

     0   :  { %8 = vsyncpa [#allocation4], 0  ;;  %s1280_s0 = inlined_call_operand.hbm [shape: bf16[8,1024], index: 0, kind: input, shape index: {}]   ;;  %s1281_s1 = inlined_call_operand.hbm [shape: bf16[1024,128], index: 1, kind: input, shape index: {}]   ;;  %s1282_s2 = inlined_call_operand.vmem [shape: f32[1,128], index: 2, kind: input, shape index: {}]   ;;  %s1283_s3 = inlined_call_operand.hbm [shape: f32[8,128], index: 3, kind: output, shape index: {}]  }
   0x1   :  { %10 = vsyncpa [#allocation4 + $0x1], 0 }
   0x2   :  { %11 = vsyncpa [#allocation7], 0 }
   0x3   :  { %13 = vsyncpa [#allocation7 + $0x1], 0 }
   0x4   :  { %14 = vsyncpa [#allocation5], 0  ;;  %s1095_s12 = smov 0   ;;  %s1097_s13 = smov 0  }
   0x5   :  { %s1099_s14 = smov 0   ;;  %s1101_s15 = smov 0  }
   0x6   :  { %s1103_s16 = smov 0   ;;  %s1105_s17 = smov 0  }
   0x7 LB: > { %s718_s18 = sadd.s32 4294967295, %s1067_s17   ;;  %s29_s19 = sadd.s32 1, %s1063_s16  ;;  %s1067_s17 = sphi %s1105_s17, %s20_s17   ;;  %s1063_s16 = sphi %s1103_s16, %s1293_s16   ;;  %s1059_s15 = sphi %s1101_s15, %s1292_s15   ;;  %s1055_s14 = sphi %s1099_s14, %s1291_s14   ;;  %s1051_s13 = sphi %s1097_s13, %s1290_s13   ;;  %s1047_s12 = sphi %s1095_s12, %s1289_s12  }
   0x8   : > { %p30_p0 = scmp.ge.s32.totalorder %s29_s19, 2  ;;  %s41_s20 = sadd.s32 1, %s1055_s14 }
   0x9   : > { %p48_p1 = scmp.ne.s32.totalorder %s1055_s14, %s1051_s13  ;;  %p49_p2 = scmp.eq.s32.totalorder %s1067_s17, 0 }
   0xa   : > { %s1295_s19 = smov (%p30_p0, %s29_s19), 0  ;;  %p54_p4 = scmp.ne.s32.totalorder %s1051_s13, %s1047_s12 }
   0xb   : > { %p1131_p3 = por %p49_p2, %p48_p1  ;;  %s37_s22 = ssub.s32 %s1063_s16, %s1295_s19 }
   0xc   : > { %p55_p5 = scmp.eq.s32.totalorder %s718_s18, 0  ;;  %p39_p6 = scmp.eq.s32.totalorder %s37_s22, 0 }
   0xd   : > { %p834_p8 = scmp.lt.s32.totalorder %s1067_s17, 2  ;;  %s1149_s25 = sand.u32 1, %s1055_s14  }
   0xe   : > { %p1140_p7 = por %p55_p5, %p54_p4  ;;  %s773_s26 = sshll.u32 %s1063_s16, 8 }
   0xf   : > { %s1146_s24 = scalar_select %p39_p6, %s1055_s14, %s41_s20  }
  0x10   : > { %s721_s27 = sshll.u32 %s1149_s25, 4  ;;  %s166_s30 = scalar_lea.hbm %s1280_s0, %s773_s26 }
  0x11   : > { %s158_s4 = scalar_lea.vmem [#allocation3], %s721_s27  ;;  %p1158_p9 = pnand %p834_p8, %p1131_p3 }
  0x12   : > { %s168_s5 = sshll.u32 %s158_s4, 4  ;;  %p727_p10 = scmp.ge.s32.totalorder %s1067_s17, 1  ;;  %s169_s5 = int_to_ptr.vmem [resolvable:$true] %s168_s5 }
  0x13   : > { %p194_p11 = scmp.lt.s32.totalorder %s1067_s17, 3  ;;  %s155_s7 = scalar_lea.sflag [#allocation4], %s1149_s25 }
  0x14   : > { %p931_p12 = pneg %p1158_p9  ;;  %s942_s8 = scalar_lea.vmem %s169_s5, 256 }
  0x15   : > { %p943_p13 = scmp.ne.s32.totalorder %s169_s5, %s942_s8  ;;  %s1069_s9 = smov [#allocation3]  }
  0x16   : > { %s947_s10 = sshll.u32 %s1069_s9, 4  ;;  %s948_s10 = int_to_ptr.vmem [resolvable:$false] %s947_s10 }
  0x17   : > { %p945_p0 = pnand %p943_p13, %p931_p12  ;;  %s949_s11 = scalar_lea.vmem %s948_s10, 512 }
  0x18   : > { %p950_p2 = scmp.lt.s32.totalorder %s169_s5, %s948_s10  ;;  %p951_p3 = scmp.lt.s32.totalorder %s949_s11, %s942_s8 }
  0x19   : > { %p946_p1 = pneg %p945_p0 }
  0x1a   : > { %p952_p4 = por %p951_p3, %p950_p2 }
  0x1c   : > { %p953_p5 = pnand %p952_p4, %p946_p1 }
  0x1e   : > { %956 = shalt.err (!%p953_p5)
}
  0x1f   : > { %830 = dma.hbm_to_vmem [thread:$0]  (!%p1158_p9), %s166_s30, 256, %s169_s5, %s155_s7  }
  0x20   : > { %p1176_p6 = pnand %p727_p10, %p194_p11  ;;  %s724_s20 = sshll.u32 %s1149_s25, 8 }
  0x21   : > { %s774_s21 = sshll.u32 %s1063_s16, 12  ;;  %s179_s28 = scalar_lea.vmem [#allocation6], %s724_s20 }
  0x22   : > { %s185_s27 = scalar_lea.hbm %s1281_s1, %s774_s21  ;;  %s186_s29 = sshll.u32 %s179_s28, 4  ;;  %s187_s29 = int_to_ptr.vmem [resolvable:$true] %s186_s29 }
  0x23   : > { %s176_s4 = scalar_lea.sflag [#allocation7], %s1149_s25  ;;  %s970_s8 = scalar_lea.vmem %s187_s29, 4096 }
  0x24   : > { %p971_p8 = scmp.ne.s32.totalorder %s187_s29, %s970_s8  ;;  %s1070_s30 = smov [#allocation6]  }
  0x25   : > { %s975_s5 = sshll.u32 %s1070_s30, 4  ;;  %s976_s5 = int_to_ptr.vmem [resolvable:$false] %s975_s5 }
  0x26   : > { %p973_p13 = pnand %p971_p8, %p931_p12  ;;  %s977_s7 = scalar_lea.vmem %s976_s5, 8192 }
  0x27   : > { %p978_p10 = scmp.lt.s32.totalorder %s187_s29, %s976_s5  ;;  %p979_p11 = scmp.lt.s32.totalorder %s977_s7, %s970_s8 }
  0x28   : > { %p974_p0 = pneg %p973_p13 }
  0x29   : > { %p980_p1 = por %p979_p11, %p978_p10 }
  0x2b   : > { %p981_p2 = pnand %p980_p1, %p974_p0 }
  0x2d   : > { %984 = shalt.err (!%p981_p2)
}
  0x2e   : > { %s1071_s9 = smov 64   ;;  %s1072_s10 = smov 4  }
  0x2f   : > { %833 = dma.hbm_to_vmem [thread:$0]  (!%p1158_p9), %s185_s27, 4096, %s187_s29, %s176_s4, %s1071_s9, %s1071_s9, %s1072_s10  }
  0x30   : > { %198 = sbr.rel (%p1176_p6) target bundleno = 638 (0x27e), region = 32  ;;  %s200_s25 = sand.u32 (!%p1176_p6), 1, %s1051_s13  }
  0x31   : > { %s728_s11 = sshll.u32 (!%p1176_p6), %s200_s25, 4  ;;  %s201_s20 = scalar_lea.sflag (!%p1176_p6), [#allocation4], %s200_s25 }
  0x32   : > { %s1194_s21 = scalar_lea.vmem (!%p1176_p6), [#allocation3], %s728_s11 }
  0x35   : > { %1034 = dma.done.wait (%p1140_p7), %s201_s20, 256  }
  0x36   : > { %1036 = vsyncadd (%p1140_p7), %s201_s20, 4294967040  ;;  %s729_s22 = sshll.u32 %s200_s25, 8  ;;  %s210_s26 = scalar_lea.sflag [#allocation7], %s200_s25 }
  0x37   : > { %s1200_s6 = scalar_lea.vmem [#allocation6], %s729_s22 }
  0x38   : > { %1038 = dma.done.wait (%p1140_p7), %s210_s26, 4096  }
  0x39   : > { %1040 = vsyncadd (%p1140_p7), %s210_s26, 4294963200  ;;  %p730_p9 = scmp.ne.s32.totalorder %s1059_s15, 0 }
  0x3b   : > { %242 = sbr.rel (%p730_p9) target bundleno = 66 (0x42), region = 44 }
  0x40   : > { %v1073_v0 = vmov 0.0  }
  0x41   : > { %243 = vst [vmem:[#allocation2] sm:$0xff] %v1073_v0 }
  0x42 PF: > { %v889_v1 = vld [vmem:[%s1200_s6 + $0x78] sm:$0xff]   ;;  %v893_v5 = vld [vmem:[%s1200_s6 + $0x70] sm:$0xff]   ;;  %v897_v9 = vld [vmem:[%s1200_s6 + $0x68] sm:$0xff]   ;;  %p767_p7 = scmp.ne.s32.totalorder %s1059_s15, 1 }
  0x43   : > { %v890_v2 = vld [vmem:[%s1200_s6 + $0xf8] sm:$0xff]   ;;  %775 = vmatprep.subr.bf16.mxu0 %v889_v1  ;;  %v894_v6 = vld [vmem:[%s1200_s6 + $0xf0] sm:$0xff]   ;;  %v898_v10 = vld [vmem:[%s1200_s6 + $0xe8] sm:$0xff]  }
  0x44   : > { %v891_v3 = vld [vmem:[%s1200_s6 + $0x38] sm:$0xff]   ;;  %797 = vmatprep.subr.bf16.mxu1 %v890_v2  ;;  %v895_v7 = vld [vmem:[%s1200_s6 + $0x30] sm:$0xff]   ;;  %v899_v11 = vld [vmem:[%s1200_s6 + $0x28] sm:$0xff]  }
  0x45   : > { %v892_v4 = vld [vmem:[%s1200_s6 + $0xb8] sm:$0xff]   ;;  %776 = vmatpush3.bf16.msra.mxu0 %v891_v3  ;;  %v896_v8 = vld [vmem:[%s1200_s6 + $0xb0] sm:$0xff]   ;;  %v900_v12 = vld [vmem:[%s1200_s6 + $0xa8] sm:$0xff]  }
  0x46   : > { %798 = vmatpush3.bf16.msra.mxu1 %v892_v4  ;;  %777 = vmatprep.subr.bf16.mxu0 %v893_v5  ;;  %v901_v13 = vld [vmem:[%s1200_s6 + $0x60] sm:$0xff]   ;;  %v905_v17 = vld [vmem:[%s1200_s6 + $0x58] sm:$0xff]   ;;  %v909_v21 = vld [vmem:[%s1200_s6 + $0x50] sm:$0xff]  }
  0x47   : > { %799 = vmatprep.subr.bf16.mxu1 %v894_v6  ;;  %v902_v14 = vld [vmem:[%s1200_s6 + $0xe0] sm:$0xff]   ;;  %v906_v18 = vld [vmem:[%s1200_s6 + $0xd8] sm:$0xff]   ;;  %v910_v22 = vld [vmem:[%s1200_s6 + $0xd0] sm:$0xff]  }
  0x48   : > { %v903_v15 = vld [vmem:[%s1200_s6 + $0x20] sm:$0xff]   ;;  %v907_v19 = vld [vmem:[%s1200_s6 + $0x18] sm:$0xff]   ;;  %v911_v23 = vld [vmem:[%s1200_s6 + $0x10] sm:$0xff]  }
  0x49   : > { %778 = vmatpush3.bf16.msra.mxu0 %v895_v7  ;;  %v904_v16 = vld [vmem:[%s1200_s6 + $0xa0] sm:$0xff]   ;;  %v908_v20 = vld [vmem:[%s1200_s6 + $0x98] sm:$0xff]   ;;  %v912_v24 = vld [vmem:[%s1200_s6 + $0x90] sm:$0xff]  }
  0x4a   : > { %800 = vmatpush3.bf16.msra.mxu1 %v896_v8  ;;  %779 = vmatprep.subr.bf16.mxu0 %v897_v9  ;;  %v913_v25 = vld [vmem:[%s1200_s6 + $0x48] sm:$0xff]   ;;  %v917_v29 = vld [vmem:[%s1200_s6 + $0x40] sm:$0xff]   ;;  %v244_v45 = vld [vmem:[#allocation2] sm:$0xff] }
  0x4b   : > { %801 = vmatprep.subr.bf16.mxu1 %v898_v10  ;;  %v914_v26 = vld [vmem:[%s1200_s6 + $0xc8] sm:$0xff]   ;;  %v918_v30 = vld [vmem:[%s1200_s6 + $0xc0] sm:$0xff]  }
  0x4c   : > { %v915_v27 = vld [vmem:[%s1200_s6 + $0x8] sm:$0xff]   ;;  %v919_v31 = vld [vmem:[%s1200_s6] sm:$0xff]  }
  0x4d   : > { %780 = vmatpush3.bf16.msra.mxu0 %v899_v11  ;;  %v916_v28 = vld [vmem:[%s1200_s6 + $0x88] sm:$0xff]   ;;  %v920_v32 = vld [vmem:[%s1200_s6 + $0x80] sm:$0xff]  }
  0x4e   : > { %802 = vmatpush3.bf16.msra.mxu1 %v900_v12  ;;  %781 = vmatprep.subr.bf16.mxu0 %v901_v13  ;;  %v245_v33 = vld [vmem:[%s1194_s21] sm:$0xff]  ;;  %v246_v34 = vld [vmem:[%s1194_s21 + $0x8] sm:$0xff] }
  0x4f   : > { %803 = vmatprep.subr.bf16.mxu1 %v902_v14  ;;  %v731_v35 = vcombine.low %v245_v33, %v245_v33  ;;  %v732_v36 = vcombine.high %v245_v33, %v245_v33  ;;  %v733_v37 = vcombine.low %v246_v34, %v246_v34  ;;  %v734_v38 = vcombine.high %v246_v34, %v246_v34 }
  0x51   : > { %782 = vmatpush3.bf16.msra.mxu0 %v903_v15  ;;  %549 = vmatprep.mubr.bf16.mxu0 %v732_v36 }
  0x52   : > { %804 = vmatpush3.bf16.msra.mxu1 %v904_v16  ;;  %783 = vmatprep.subr.bf16.mxu0 %v905_v17 }
  0x53   : > { %805 = vmatprep.subr.bf16.mxu1 %v906_v18  ;;  %589 = vmatprep.mubr.bf16.mxu1 %v734_v38 }
  0x55   : > { %784 = vmatpush3.bf16.msra.mxu0 %v907_v19 }
  0x56   : > { %806 = vmatpush3.bf16.msra.mxu1 %v908_v20  ;;  %785 = vmatprep.subr.bf16.mxu0 %v909_v21 }
  0x57   : > { %807 = vmatprep.subr.bf16.mxu1 %v910_v22 }
  0x59   : > { %786 = vmatpush3.bf16.msra.mxu0 %v911_v23 }
  0x5a   : > { %808 = vmatpush3.bf16.msra.mxu1 %v912_v24  ;;  %787 = vmatprep.subr.bf16.mxu0 %v913_v25 }
  0x5b   : > { %809 = vmatprep.subr.bf16.mxu1 %v914_v26 }
  0x5d   : > { %788 = vmatpush3.bf16.msra.mxu0 %v915_v27 }
  0x5e   : > { %810 = vmatpush3.bf16.msra.mxu1 %v916_v28  ;;  %789 = vmatprep.subr.bf16.mxu0 %v917_v29 }
  0x5f   : > { %811 = vmatprep.subr.bf16.mxu1 %v918_v30 }
  0x61   : > { %790 = vmatpush3.bf16.msra.mxu0 %v919_v31 }
  0x62   : > { %812 = vmatpush3.bf16.msra.mxu1 %v920_v32 }
  0x64   : > { %550 = vmatmul.mubr.bf16.vlgmr.msra.gmra.mxu0 %v731_v35 }
  0x65   : > { %590 = vmatmul.mubr.bf16.vlgmr.msra.gmra.mxu1 %v733_v37 }
 0x124   : > { %v791_v39 = vpop.f32.mrf.mxu0 }
 0x125   : > { %v813_v40 = vpop.f32.mrf.mxu1 }
 0x126   : > { %v792_v41 = vpop.f32.mrf.mxu0 }
 0x127   : > { %v814_v42 = vpop.f32.mrf.mxu1  ;;  %v793_v43 = vadd.f32 %v792_v41, %v791_v39 }
 0x128   : > { %v815_v44 = vadd.f32 %v814_v42, %v813_v40  ;;  %v794_v46 = vpop.f32.mrf.mxu0 }
 0x129   : > { %v816_v47 = vpop.f32.mrf.mxu1 }
 0x12a   : > { %v592_v48 = vadd.f32 %v815_v44, %v793_v43  ;;  %v795_v49 = vpop.f32.mrf.mxu0  ;;  %602 = sbr.rel (%p767_p7) target bundleno = 623 (0x26f), region = 48 }
 0x12b   : > { %v817_v50 = vpop.f32.mrf.mxu1 }
 0x12c   : > { %v597_v51 = vadd.f32 %v592_v48, %v244_v45 }
 0x12e   : > { %598 = vst [vmem:[#allocation2] sm:$0xff] %v597_v51 }
 0x12f   : > { %v768_v53 = vld [vmem:[%s1282_s2] ss:$0 sm:$0xff] }
 0x135   : > { %v603_v52 = vld [vmem:[#allocation2] sm:$0xff] }
 0x136   : > { %v611_v54 = vadd.f32 %v768_v53, %v603_v52 }
 0x138   : > { %612 = vmax.xlane.f32.xlu0 %v611_v54 }
 0x1c1   : > { %v613_v55 = vpop.xlane.xlu0 %612 }
 0x1c2   : > { %v614_v56 = vsub.f32 %v611_v54, %v613_v55 }
 0x1c4   : > { %v615_v57 = vmul.f32 1.442695, %v614_v56 }
 0x1c6   : > { %925 = vpow2.f32 %v615_v57 }
 0x1d3   : > { %v926_v58 = vpop.eup %925 }
 0x1d4   : > { %617 = vadd.xlane.f32.xlu0 %v926_v58 }
 0x25d   : > { %v618_v59 = vpop.xlane.xlu0 %617 }
 0x25e   : > { %927 = vrcp.f32 %v618_v59 }
 0x26b   : > { %v928_v60 = vpop.eup %927 }
 0x26c   : > { %v620_v61 = vmul.f32 %v928_v60, %v926_v58 }
 0x26e   : > { %621 = vst [vmem:[#allocation8] sm:$0xff] %v620_v61 }
 0x26f PF: > { %p1247_p12 = scmp.eq.s32.totalorder %s718_s18, 1  ;;  %s1074_s27 = smov [#allocation8]  }
 0x270   : > { %s631_s28 = sshll.u32 %s1074_s27, 4  ;;  %s632_s28 = int_to_ptr.vmem [resolvable:$true] %s631_s28 }
 0x271   : > { %s985_s29 = scalar_lea.vmem %s632_s28, 128  ;;  %p992_p6 = scmp.lt.s32.totalorder %s632_s28, %s632_s28 }
 0x272   : > { %p986_p3 = scmp.ne.s32.totalorder %s632_s28, %s985_s29  ;;  %p993_p8 = scmp.lt.s32.totalorder %s985_s29, %s985_s29 }
 0x274   : > { %p987_p4 = pnand %p986_p3, %p1247_p12  ;;  %p994_p13 = por %p993_p8, %p992_p6 }
 0x276   : > { %p988_p5 = pneg %p987_p4 }
 0x278   : > { %p995_p0 = pnand %p994_p13, %p988_p5 }
 0x27a   : > { %998 = shalt.err (!%p995_p0)
}
 0x27b   : > { %824 = dma.vmem_to_hbm [thread:$0]  (%p1247_p12), %s632_s28, 128, %s1283_s3, [#allocation5]  }
 0x27c   : > { %1042 = dma.done.wait (%p1247_p12), [#allocation5], 128  }
 0x27d   : > { %1044 = vsyncadd (%p1247_p12), [#allocation5], 4294967168 }
 0x27e PF: > { %s20_s17 = sadd.s32 1, %s1067_s17   ;;  %s1289_s12 = smov %s1051_s13 }
 0x27f   : > { %p17_p10 = scmp.ge.s32.totalorder %s20_s17, 4   ;;  %s1290_s13 = smov %s1055_s14 }
 0x280   : > { %s1291_s14 = smov %s1146_s24  ;;  %s1292_s15 = smov %s1063_s16 }
 0x281   : > { %s1293_s16 = smov %s1295_s19  ;;  %19 = sbr.rel (!%p17_p10) target bundleno = 7 (0x7), region = 91 }
 0x286   :  { %644 = vsyncpa [#allocation4], 1 }
 0x287   :  { %646 = vsyncpa [#allocation4 + $0x1], 1 }
 0x288   :  { %647 = vsyncpa [#allocation7], 1 }
 0x289   :  { %649 = vsyncpa [#allocation7 + $0x1], 1 }
 0x28a   :  { %650 = vsyncpa [#allocation5], 1 }
 0x28b   :  { %652 = vsyncpa [#allocation5 + $0x1], 1 }

</bundles_post_ra>
